<compile_context>
chip_gen: v7x
topology: tpu7x:2x2x1
jax: 0.10.0
libtpu: 0.0.40
codegen_flags: <defaults>
</compile_context>

<pallas_src>
from functools import partial

import jax
import jax.numpy as jnp
from jax.experimental import pallas as pl
from jax.experimental.pallas import tpu as pltpu

LANE = 128          # TPU lane width
SUBLANE = 8         # f32 sublane height


# ----------------------------------------------------------------------------
# Helpers reconstructing the (unshown) reference helpers
# ----------------------------------------------------------------------------
def get_layer_dim(input_dim, latent_dim, n_layers, enc_factor):
    """Geometric shrink from input_dim toward latent_dim over n_layers steps."""
    # TODO(synk): exact get_layer_dim not provided in the source; reconstruction.
    dims = [input_dim]
    for i in range(1, n_layers):
        d = int(round(input_dim * (enc_factor ** i)))
        dims.append(max(d, latent_dim))
    dims.append(latent_dim)
    return dims


def xavier_uniform(key, out_dim, in_dim):
    bound = (6.0 / (in_dim + out_dim)) ** 0.5
    return jax.random.uniform(key, (out_dim, in_dim), jnp.float32, -bound, bound)


def _round_up(n, m):
    return m * pl.cdiv(n, m)


# ----------------------------------------------------------------------------
# One-time probe: pin down pltpu.roll's shift convention (cheap insurance)
# ----------------------------------------------------------------------------
def _roll_convention():
    def probe(x_ref, o_ref):
        o_ref[...] = pltpu.roll(x_ref[...], shift=1, axis=1)

    x = jax.lax.broadcasted_iota(jnp.float32, (SUBLANE, LANE), 1)
    y = pl.pallas_call(
        probe, out_shape=jax.ShapeDtypeStruct((SUBLANE, LANE), jnp.float32))(x)
    # jnp.roll convention: element i -> i+shift, so y[0,1] == x[0,0] == 0.
    return 1 if float(y[0, 1]) == 0.0 else -1


def _roll_amount(displacement, size, conv):
    """Roll amount that moves lane i -> lane i+displacement for either convention."""
    return displacement % size if conv == 1 else (-displacement) % size


# ----------------------------------------------------------------------------
# Fused VAE forward kernel (one batch block per grid step)
# ----------------------------------------------------------------------------
def _vae_fused_kernel(n_enc, n_dec, latent, input_dim, io_pad, kn,
                      shift_eps, shift_head,
                      xin_ref, w_ref, b_ref, out_ref):
    """xin_ref : (BB, io_pad) f32, lanes [0,input_dim)=x, [input_dim,input_dim+L)=eps
       w_ref   : (n_lin, d_pad, d_pad) bf16 zero-padded weight slab
       b_ref   : (n_lin, 1, d_pad)     f32  zero-padded bias slab
       out_ref : (BB, io_pad) f32, lanes [0,input_dim)=recon,
                 [input_dim,input_dim+L)=mu, [input_dim+L,input_dim+2L)=logvar, rest 0
       kn      : per-linear (K, N) dims rounded up to 128 (static tuple)."""
    f32 = jnp.float32
    xin = xin_ref[...]
    rows = xin.shape[0]

    def linear(h, li, relu):
        K, N = kn[li]
        a = h[:, :K].astype(jnp.bfloat16)                       # bf16 MXU inputs
        r = jnp.dot(a, w_ref[li, :K, :N], preferred_element_type=f32)
        r = r + b_ref[li, :, :N]                                # f32 bias, f32 accum
        return jnp.maximum(r, 0.0) if relu else r

    # ---- encoder MLP (Linear -> ReLU; dropout = identity at inference) ----
    # eps lanes (>= input_dim) inside the K0 slice hit zero-padded weight rows.
    h = xin
    for li in range(n_enc):
        h = linear(h, li, relu=True)

    # ---- fused mu||logvar head: ONE matmul ----
    li_head = n_enc
    head = linear(h, li_head, relu=False)                       # (rows, n_z)
    n_z = kn[li_head][1]
    lane_z = jax.lax.broadcasted_iota(jnp.int32, head.shape, 1)
    mu_part = jnp.where(head < 1e-6, 0.0, head)                 # torch.where(mu < 1e-6, 0, mu)
    lv_clip = jnp.clip(head, 0.1, 20.0)                         # torch.clamp(logvar, 0.1, 20)

    # ---- reparameterize, folded into the first decoder matmul ----
    # eps sits at lanes [input_dim, input_dim+L) of the input slab; an XLU lane
    # roll moves it to [L, 2L), where the duplicated decoder weight rows expect it:
    # comb = [mu | eps*std | 0], comb @ [W_dec1; W_dec1; 0] == (mu + eps*std) @ W_dec1.
    eps_sh = pltpu.roll(xin, shift=shift_eps, axis=1)[:, :n_z]
    comb = jnp.where(lane_z < latent, mu_part,
                     jnp.where(lane_z < 2 * latent,
                               eps_sh * jnp.exp(0.5 * lv_clip), 0.0))

    # ---- decoder MLP (ReLU on all but the final linear layer) ----
    h = comb
    for i in range(n_dec):
        h = linear(h, li_head + 1 + i, relu=(i < n_dec - 1))

    # ---- pack ONE lane-dense output slab (single unmasked full-lane store) ----
    head_out = jnp.where(lane_z < latent, mu_part,
                         jnp.where(lane_z < 2 * latent, lv_clip, 0.0))
    if n_z < io_pad:                                            # trace-time padding
        head_out = jnp.concatenate(
            [head_out, jnp.zeros((rows, io_pad - n_z), f32)], axis=1)
    n_last = kn[-1][1]
    if n_last < io_pad:
        h = jnp.concatenate([h, jnp.zeros((rows, io_pad - n_last), f32)], axis=1)
    head_sh = pltpu.roll(head_out, shift=shift_head, axis=1)    # mu|lv -> lanes >= input_dim
    lane_io = jax.lax.broadcasted_iota(jnp.int32, (rows, io_pad), 1)
    out_ref[...] = jnp.where(lane_io < input_dim, h, head_sh)


# ----------------------------------------------------------------------------
# Parameter packing: one bf16 padded weight slab + one f32 bias slab
# ----------------------------------------------------------------------------
def _pad2(a, rows, cols):
    return jnp.pad(a, ((0, rows - a.shape[0]), (0, cols - a.shape[1])))


def pack_params(params, input_dim, latent_dim):
    enc, dec = params["enc"], params["dec"]

    # true (in, out) dims per linear, in kernel order
    true_kn = [w.shape for w, _ in enc]
    true_kn.append((enc[-1][0].shape[1], 2 * latent_dim))       # fused mu||logvar head
    true_kn.append((2 * latent_dim, dec[0][0].shape[1]))        # duplicated first decoder
    true_kn += [w.shape for w, _ in dec[1:]]

    all_dims = [input_dim, 2 * latent_dim] + [d for pair in true_kn for d in pair]
    d_pad = _round_up(max(all_dims), LANE)                      # weight-slab square side
    io_pad = _round_up(input_dim + 2 * latent_dim, LANE)        # packed I/O slab width
    kn = tuple((_round_up(k, LANE), _round_up(n, LANE)) for k, n in true_kn)

    ws, bs = [], []
    for w, b in enc:                                            # encoder linears
        ws.append(_pad2(w, d_pad, d_pad)); bs.append(_pad2(b, 1, d_pad))
    w_head = jnp.concatenate([params["mu_w"], params["lv_w"]], axis=1)   # fused head
    b_head = jnp.concatenate([params["mu_b"], params["lv_b"]], axis=1)
    ws.append(_pad2(w_head, d_pad, d_pad)); bs.append(_pad2(b_head, 1, d_pad))
    for i, (w, b) in enumerate(dec):                            # decoder linears
        if i == 0:
            # duplicate the `latent` rows: folds z = mu + eps*std into this matmul
            w = jnp.concatenate([w, w], axis=0)
        ws.append(_pad2(w, d_pad, d_pad)); bs.append(_pad2(b, 1, d_pad))

    meta = dict(n_enc=len(enc), n_dec=len(dec), latent=latent_dim,
                input_dim=input_dim, d_pad=d_pad, io_pad=io_pad, kn=kn)
    return dict(w_slab=jnp.stack(ws).astype(jnp.bfloat16),      # half DMA/VMEM, native MXU
                b_slab=jnp.stack(bs).astype(jnp.float32),       # tiny; keep exact f32
                meta=meta)


# ----------------------------------------------------------------------------
# Batch tiling: pad only to a multiple of 8; keep both v7x TCs busy when possible
# ----------------------------------------------------------------------------
def _pick_batch_tiling(B):
    if B <= 16:
        bb = _round_up(B, SUBLANE)                  # one tiny block, minimal padding
    elif B <= 1024:
        bb = _round_up(pl.cdiv(B, 2), SUBLANE)      # >=2 blocks -> both v7x TCs busy
    else:
        bb = 512                                    # big tiles amortize per-step overhead
    b_pad = bb * pl.cdiv(B, bb)
    return bb, b_pad


# ----------------------------------------------------------------------------
# Wrapper factory
# ----------------------------------------------------------------------------
def make_vae_forward(params, input_dim, latent_dim):
    packed = pack_params(params, input_dim, latent_dim)
    m = packed["meta"]
    n_enc, n_dec, latent = m["n_enc"], m["n_dec"], m["latent"]
    d_pad, io_pad, kn = m["d_pad"], m["io_pad"], m["kn"]
    n_lin = n_enc + 1 + n_dec

    conv = _roll_convention()
    shift_eps = _roll_amount(latent - input_dim, io_pad, conv)   # eps -> lanes [L, 2L)
    shift_head = _roll_amount(input_dim, io_pad, conv)           # mu|lv -> lanes >= input_dim

    def fwd(x, eps, w_slab, b_slab):
        B = x.shape[0]
        bb, b_pad = _pick_batch_tiling(B)

        # single lane-dense input slab (built under jit -> fuses with surrounding XLA)
        xin = jnp.zeros((b_pad, io_pad), jnp.float32)
        xin = xin.at[:B, :input_dim].set(x.astype(jnp.float32))
        xin = xin.at[:B, input_dim:input_dim + latent].set(eps.astype(jnp.float32))

        w_bytes = w_slab.size * w_slab.dtype.itemsize
        b_bytes = b_slab.size * b_slab.dtype.itemsize
        vmem_need = 2 * (w_bytes + b_bytes) + 4 * bb * io_pad * 4 + (2 << 20)
        cost = pl.CostEstimate(
            flops=2 * b_pad * sum(k * n for k, n in kn),
            transcendentals=b_pad * kn[n_enc][1],
            bytes_accessed=2 * b_pad * io_pad * 4 + w_bytes + b_bytes)

        out = pl.pallas_call(
            partial(_vae_fused_kernel, n_enc, n_dec, latent, input_dim, io_pad,
                    kn, shift_eps, shift_head),
            out_shape=jax.ShapeDtypeStruct((b_pad, io_pad), jnp.float32),
            grid=(b_pad // bb,),
            in_specs=[
                pl.BlockSpec((bb, io_pad), lambda i: (i, 0)),
                pl.BlockSpec((n_lin, d_pad, d_pad), lambda i: (0, 0, 0)),
                pl.BlockSpec((n_lin, 1, d_pad), lambda i: (0, 0, 0)),
            ],
            out_specs=pl.BlockSpec((bb, io_pad), lambda i: (i, 0)),
            compiler_params=pltpu.CompilerParams(
                dimension_semantics=("parallel",),     # shards batch blocks over v7x TCs
                vmem_limit_bytes=min(128 << 20, max(vmem_need, 16 << 20))),
            cost_estimate=cost,
        )(xin, w_slab, b_slab)

        recon = out[:B, :input_dim]
        mu = out[:B, input_dim:input_dim + latent]
        logvar = out[:B, input_dim + latent:input_dim + 2 * latent]
        return recon, mu, logvar

    jitted = jax.jit(fwd)
    return lambda x, eps: jitted(x, eps, packed["w_slab"], packed["b_slab"])


# ----------------------------------------------------------------------------
# Deterministic parameter construction (mirrors VarixTune.__init__)
# ----------------------------------------------------------------------------
def build_params(key, input_dim, latent_dim, n_layers, enc_factor):
    enc_dim = get_layer_dim(input_dim, latent_dim, n_layers, enc_factor)
    dec_dim = enc_dim[::-1]

    def make_linear(k, din, dout):
        w = xavier_uniform(k, dout, din)            # PyTorch (out, in) xavier-uniform
        b = jnp.full((1, dout), 0.01, jnp.float32)  # bias.fill_(0.01)
        return w.T, b                               # pre-transpose -> (in, out)

    keys = iter(jax.random.split(key, 64))
    enc = [make_linear(next(keys), enc_dim[i], enc_dim[i + 1])
           for i in range(len(enc_dim) - 2)]
    mu_w, mu_b = make_linear(next(keys), enc_dim[-2], latent_dim)
    lv_w, lv_b = make_linear(next(keys), enc_dim[-2], latent_dim)
    dec = [make_linear(next(keys), dec_dim[i], dec_dim[i + 1])
           for i in range(len(dec_dim) - 1)]        # last one is the only_linear layer
    return dict(enc=enc, mu_w=mu_w, mu_b=mu_b, lv_w=lv_w, lv_b=lv_b, dec=dec), enc_dim


# ----------------------------------------------------------------------------
# References
# ----------------------------------------------------------------------------
def reference_f32(x, eps, params):
    """Pure-f32 JAX reference following the PyTorch module semantics."""
    h = x
    for w, b in params["enc"]:
        h = jnp.maximum(h @ w + b, 0.0)
    mu = h @ params["mu_w"] + params["mu_b"]
    logvar = jnp.clip(h @ params["lv_w"] + params["lv_b"], 0.1, 20.0)
    mu = jnp.where(mu < 1e-06, jnp.zeros_like(mu), mu)
    h = mu + eps * jnp.exp(0.5 * logvar)
    n_dec = len(params["dec"])
    for i, (w, b) in enumerate(params["dec"]):
        h = h @ w + b
        if i < n_dec - 1:
            h = jnp.maximum(h, 0.0)
    return h, mu, logvar


def reference_bf16_mirror(x, eps, params):
    """Mirrors the kernel's arithmetic exactly: bf16 matmul inputs, f32 accumulation
    and elementwise math, reparameterize folded as two matmul terms."""
    def mm(a, w):
        return jnp.dot(a.astype(jnp.bfloat16), w.astype(jnp.bfloat16),
                       preferred_element_type=jnp.float32)

    h = x
    for w, b in params["enc"]:
        h = jnp.maximum(mm(h, w) + b, 0.0)
    mu = mm(h, params["mu_w"]) + params["mu_b"]
    logvar = jnp.clip(mm(h, params["lv_w"]) + params["lv_b"], 0.1, 20.0)
    mu = jnp.where(mu < 1e-06, jnp.zeros_like(mu), mu)
    std = jnp.exp(0.5 * logvar)
    dec = params["dec"]
    w0, b0 = dec[0]
    h = mm(mu, w0) + mm(eps * std, w0) + b0
    if len(dec) > 1:
        h = jnp.maximum(h, 0.0)
    for i, (w, b) in enumerate(dec[1:]):
        h = mm(h, w) + b
        if i < len(dec) - 2:
            h = jnp.maximum(h, 0.0)
    return h, mu, logvar


if __name__ == "__main__":
    # "Trial" hyper-parameters fixed deterministically (what optuna would suggest)
    INPUT_DIM = 64
    LATENT_DIM = 8       # cfg['LATENT_DIM_FIXED']
    N_LAYERS = 3         # fc_n_layers
    ENC_FACTOR = 0.5     # encoding_factor -> enc_dim = [64, 32, 16, 8]
    BATCH = 8

    root = jax.random.PRNGKey(0)
    k_param, k_x, k_eps = jax.random.split(root, 3)

    params, _ = build_params(k_param, INPUT_DIM, LATENT_DIM, N_LAYERS, ENC_FACTOR)
    vae_forward = make_vae_forward(params, INPUT_DIM, LATENT_DIM)

    x = jax.random.normal(k_x, (BATCH, INPUT_DIM), jnp.float32)   # x.view(-1, input_dim)
    eps = jax.random.normal(k_eps, (BATCH, LATENT_DIM), jnp.float32)

    recon, mu, logvar = vae_forward(x, eps)
    jax.block_until_ready((recon, mu, logvar))

    assert recon.shape == (BATCH, INPUT_DIM)
    assert mu.shape == (BATCH, LATENT_DIM) and logvar.shape == (BATCH, LATENT_DIM)

    # tight check vs a reference mirroring the kernel's bf16-MXU arithmetic
    r_m, mu_m, lv_m = reference_bf16_mirror(x, eps, params)
    assert bool(jnp.allclose(recon, r_m, atol=2e-3, rtol=2e-3))
    assert bool(jnp.allclose(mu, mu_m, atol=2e-3, rtol=2e-3))
    assert bool(jnp.allclose(logvar, lv_m, atol=2e-3, rtol=2e-3))

    # gross check vs the pure-f32 PyTorch-semantics reference (drift = bf16 MXU inputs)
    r_f, mu_f, lv_f = reference_f32(x, eps, params)
    assert float(jnp.max(jnp.abs(recon - r_f))) < 0.25
    assert float(jnp.max(jnp.abs(mu - mu_f))) < 0.25
    assert float(jnp.max(jnp.abs(logvar - lv_f))) < 0.25

    print("KERNEL_OK")
</pallas_src>

<mosaic_0001>
module attributes {stable_mosaic.version = 11 : i64} {
  func.func @probe(%arg0: memref<8x128xf32, #tpu.memory_space<vmem>>, %arg1: memref<8x128xf32, #tpu.memory_space<vmem>>) attributes {dimension_semantics = [], scalar_prefetch = 0 : i64, scratch_operands = 0 : i64, tpu.core_type = #tpu.core_type<tc>} {
    %c0 = arith.constant 0 : index
    %c0_0 = arith.constant 0 : index
    %0 = vector.load %arg0[%c0, %c0_0] : memref<8x128xf32, #tpu.memory_space<vmem>>, vector<8x128xf32>
    %c1_i32 = arith.constant 1 : i32
    %1 = tpu.dynamic_rotate %0 by %c1_i32 dim 1 : vector<8x128xf32>, i32 -> vector<8x128xf32>
    %c0_1 = arith.constant 0 : index
    %c0_2 = arith.constant 0 : index
    %2 = vector.load %arg1[%c0_1, %c0_2] : memref<8x128xf32, #tpu.memory_space<vmem>>, vector<8x128xf32>
    tpu.vector_store %arg1[%c0_1, %c0_2], %1 {strides = array<i32>} : memref<8x128xf32, #tpu.memory_space<vmem>>, vector<8x128xf32>,
    return
  }
}

</mosaic_0001>

<bundles_post_ra>
// kernel: tpu_custom_call.1
= control target key start
LH: loop header
LB: loop body
LE: loop exit
PB: predicated region body
PF: predicated region fallthrough
CT: control target
= control target key end

     0   :  { %6 = vsyncpa [#allocation3], 0  ;;  %s128_s0 = inlined_call_operand.hbm [shape: f32[8,128], index: 0, kind: input, shape index: {}]   ;;  %s129_s1 = inlined_call_operand.hbm [shape: f32[8,128], index: 1, kind: output, shape index: {}]  }
   0x1   :  { %7 = vsyncpa [#allocation4], 0  ;;  %s91_s6 = smov [#allocation2]   ;;  %s43_s10 = scalar_lea.hbm %s128_s0, 128 }
   0x2   :  { %s14_s7 = sshll.u32 %s91_s6, 4  ;;  %p44_p0 = scmp.ne.s32.totalorder %s128_s0, %s43_s10  ;;  %s15_s7 = int_to_ptr.vmem [resolvable:$true] %s14_s7 }
   0x3   :  { %p47_p1 = scmp.lt.u32.totalorder %s43_s10, %s128_s0 }
   0x5   :  { %p49_p2 = pnand %p47_p1, %p44_p0 }
   0x7   :  { %52 = shalt.err (!%p49_p2)
}
   0x8   :  { %s53_s15 = scalar_lea.vmem %s15_s7, 128  ;;  %p58_p4 = scmp.lt.s32.totalorder %s15_s7, %s15_s7 }
   0x9   :  { %p54_p3 = scmp.ne.s32.totalorder %s15_s7, %s53_s15  ;;  %p59_p5 = scmp.lt.s32.totalorder %s53_s15, %s53_s15 }
   0xb   :  { %p60_p6 = por %p59_p5, %p58_p4 }
   0xd   :  { %p61_p7 = pnand %p60_p6, %p54_p3 }
   0xf   :  { %64 = shalt.err (!%p61_p7)
}
  0x10   :  { %17 = dma.hbm_to_vmem [thread:$0]  %s128_s0, 128, %s15_s7, [#allocation3]  }
  0x11   :  { %87 = dma.done.wait [#allocation3], 128  }
  0x12   :  { %88 = vsyncadd [#allocation3], 4294967168  ;;  %v21_v0 = vld [vmem:[#allocation2] sm:$0xff]  ;;  %s92_s18 = smov 1   ;;  %s93_s19 = smov [#allocation5]  }
  0x13   :  { %22 = vrot.lane.b32.xlu0 %v21_v0, %s92_s18  ;;  %s31_s20 = sshll.u32 %s93_s19, 4  ;;  %s32_s20 = int_to_ptr.vmem [resolvable:$true] %s31_s20 }
  0x14   :  { %s65_s21 = scalar_lea.vmem %s32_s20, 128  ;;  %p70_p9 = scmp.lt.s32.totalorder %s32_s20, %s32_s20 }
  0x15   :  { %p66_p8 = scmp.ne.s32.totalorder %s32_s20, %s65_s21  ;;  %p71_p10 = scmp.lt.s32.totalorder %s65_s21, %s65_s21 }
  0x17   :  { %p72_p11 = por %p71_p10, %p70_p9 }
  0x19   :  { %p73_p12 = pnand %p72_p11, %p66_p8 }
  0x85   :  { %v23_v1 = vpop.permute.xlu0 %22 }
  0x86   :  { %24 = vst [vmem:[#allocation5] sm:$0xff] %v23_v1 }
  0x87   :  { %76 = shalt.err (!%p73_p12)
}
  0x88   :  { %s77_s0 = scalar_lea.hbm %s129_s1, 128 }
  0x89   :  { %p78_p13 = scmp.ne.s32.totalorder %s129_s1, %s77_s0  ;;  %p81_p0 = scmp.lt.u32.totalorder %s77_s0, %s129_s1 }
  0x8b   :  { %p83_p1 = pnand %p81_p0, %p78_p13 }
  0x8d   :  { %86 = shalt.err (!%p83_p1)
}
  0x8e   :  { %34 = dma.vmem_to_hbm [thread:$0]  %s32_s20, 128, %s129_s1, [#allocation4]  }
  0x8f   :  { %89 = dma.done.wait [#allocation4], 128  }
  0x90   :  { %90 = vsyncadd [#allocation4], 4294967168 }
  0x91   :  { %38 = vsyncpa [#allocation3], 1 }
  0x92   :  { %39 = vsyncpa [#allocation4], 1 }

</bundles_post_ra>
